<compile_context>
chip_gen: v6e
topology: v6e:2x2x1
jax: 0.10.0
libtpu: 0.0.40
codegen_flags: <defaults>
</compile_context>

<pallas_src>
import functools

import jax
import jax.numpy as jnp
from jax.experimental import pallas as pl
from jax.experimental.pallas import tpu as pltpu

GAMMA = 0.3
SMOOTH = 1e-06

_LANE = 128


def _round_up(x, m):
    return (x + m - 1) // m * m


@functools.lru_cache(maxsize=1)
def _hw_params():
    """Returns (per_block_budget_bytes, vmem_limit_bytes, assumed_tensorcores)."""
    vmem_cap = None
    try:
        vmem_cap = int(pltpu.get_tpu_info().vmem_capacity_bytes)
    except Exception:
        vmem_cap = None
    if vmem_cap is not None and vmem_cap >= 100 * 1024 * 1024:
        # 128 MiB VMEM parts (v5e / v6e): bigger blocks amortize the ~0.35us
        # per-grid-step overhead; one TensorCore per chip.
        return 8 * 1024 * 1024, 80 * 1024 * 1024, 1
    # v7x (64 MiB VMEM) or unknown backend: conservative sizes, 2 TCs.
    return 4 * 1024 * 1024, 40 * 1024 * 1024, 2


def _choose_tiles(nc, hw, itemsize, pack, budget_bytes, n_cores):
    """Pick (tr, tk, ns) = row tile, spatial tile, parallel HW splits."""
    budget_elems = max(pack * _LANE, budget_bytes // itemsize)

    if hw * pack <= budget_elems:
        # Whole spatial axis fits in one block even at the minimum row tile:
        # no spatial chunking; spend the budget on rows instead.
        tk = hw
        tr = max(pack, (budget_elems // max(hw, 1)) // pack * pack)
        tr = min(tr, _round_up(nc, pack), 4096)
        # Keep enough row blocks for pipelining / megacore sharding when there
        # is enough work (>= 2 blocks on 1-TC parts, >= 4 on 2-TC parts).
        min_blocks = 2 * n_cores
        if nc >= min_blocks * pack:
            tr = min(tr, max(pack, _round_up(pl.cdiv(nc, min_blocks), pack)))
    else:
        # Large spatial extent: chunk HW on the reduction axis, row tile at the
        # packing minimum.  Prefer a tk that exactly divides hw so the
        # ragged-lane mask compiles away entirely.
        tr = pack
        tk_cap = max(_LANE, (budget_elems // tr) // _LANE * _LANE)
        tk = 0
        if hw % _LANE == 0:
            cand = min(tk_cap, hw)
            while cand >= _LANE:
                if hw % cand == 0:
                    tk = cand
                    break
                cand -= _LANE
        if tk == 0:
            tk = tk_cap  # fallback: ragged last chunk, masked in-kernel

    nk_total = pl.cdiv(hw, tk)
    nb = pl.cdiv(nc, tr)
    # Split the HW reduction across a second *parallel* grid axis when the row
    # axis alone cannot feed every TensorCore (typical segmentation shapes have
    # N*C <= 16 so nb is often 1).  Only when the split is exact.
    ns = 1
    if n_cores > 1 and hw % tk == 0 and nk_total % 2 == 0 and nb < 2 * n_cores:
        ns = 2
    return tr, tk, ns


def _partial_dice_kernel(x_ref, t_ref, inter_out, union_out,
                         inter_acc, union_acc, *, hw, tk, nk):
    # x_ref / t_ref       : (tr, tk) tile of logits / targets (native dtype)
    # inter_out/union_out : (1, tr, 1) partial sums for this (row blk, split)
    # inter_acc/union_acc : (tr, 1) f32 VMEM accumulators across HW chunks
    k = pl.program_id(2)

    @pl.when(k == 0)
    def _():
        inter_acc[...] = jnp.zeros_like(inter_acc)
        union_acc[...] = jnp.zeros_like(union_acc)

    x = x_ref[...].astype(jnp.float32)
    t = t_ref[...].astype(jnp.float32)
    pred = jax.nn.sigmoid(x)                       # EUP exp + VPU elementwise

    if hw % tk != 0:
        # Ragged last HW chunk (only when no multiple of 128 divides hw):
        # mask padded lanes via a cheap (1, tk) iota broadcast.
        s = pl.program_id(1)
        lane = jax.lax.broadcasted_iota(jnp.int32, (1, tk), 1)
        valid = ((s * nk + k) * tk + lane) < hw
        pred = jnp.where(valid, pred, 0.0)
        t = jnp.where(valid, t, 0.0)

    # Strictly per-row partial sums (see correctness invariant above).
    inter_acc[...] += jnp.sum(pred * t, axis=-1, keepdims=True)
    # Fused union reduction: one XLU lane-reduce instead of two.
    union_acc[...] += jnp.sum(pred + t, axis=-1, keepdims=True)

    @pl.when(k == nk - 1)
    def _():
        inter_out[0] = inter_acc[...]
        union_out[0] = union_acc[...]


def exp_log_dice_loss(logits, targets, *, smooth=SMOOTH, gamma=GAMMA):
    """logits, targets: (N, C, H, W) arrays. Returns scalar f32 loss."""
    N, C, H, W = logits.shape
    nc = N * C
    hw = H * W

    # Metadata-only reshape; no dtype cast, no padding copy on the HBM inputs.
    x2d = logits.reshape(nc, hw)
    t2d = targets.reshape(nc, hw)

    isx = jnp.dtype(x2d.dtype).itemsize
    ist = jnp.dtype(t2d.dtype).itemsize
    itemsize = max(isx, ist)
    min_itemsize = max(1, min(isx, ist, 4))
    pack = 8 * (4 // min_itemsize)   # sublane packing tile of narrowest input

    budget, vmem_limit, n_cores = _hw_params()
    tr, tk, ns = _choose_tiles(nc, hw, itemsize, pack, budget, n_cores)
    nb = pl.cdiv(nc, tr)             # row blocks        (parallel)
    nk = pl.cdiv(hw, tk) // ns       # chunks per split  (reduction, last)

    kernel = functools.partial(_partial_dice_kernel, hw=hw, tk=tk, nk=nk)

    cost = pl.CostEstimate(
        flops=int(4 * nc * hw),
        transcendentals=int(nc * hw),
        bytes_accessed=int(nc * hw * (isx + ist) + 2 * ns * nb * tr * 4),
    )

    inter_p, union_p = pl.pallas_call(
        kernel,
        out_shape=(jax.ShapeDtypeStruct((ns, nb * tr, 1), jnp.float32),
                   jax.ShapeDtypeStruct((ns, nb * tr, 1), jnp.float32)),
        grid_spec=pltpu.PrefetchScalarGridSpec(
            num_scalar_prefetch=0,
            grid=(nb, ns, nk),
            in_specs=[
                pl.BlockSpec((tr, tk), lambda i, s, k: (i, s * nk + k)),
                pl.BlockSpec((tr, tk), lambda i, s, k: (i, s * nk + k)),
            ],
            out_specs=[
                pl.BlockSpec((1, tr, 1), lambda i, s, k: (s, i, 0)),
                pl.BlockSpec((1, tr, 1), lambda i, s, k: (s, i, 0)),
            ],
            scratch_shapes=[
                pltpu.VMEM((tr, 1), jnp.float32),   # inter accumulator
                pltpu.VMEM((tr, 1), jnp.float32),   # union accumulator
            ],
        ),
        compiler_params=pltpu.CompilerParams(
            dimension_semantics=("parallel", "parallel", "arbitrary"),
            vmem_limit_bytes=vmem_limit,
        ),
        cost_estimate=cost,
    )(x2d, t2d)

    # Tiny epilogue on (NC,) terms: combine HW splits, dice -> -log -> pow -> mean.
    inter = jnp.sum(inter_p[:, :nc, 0], axis=0)
    union = jnp.sum(union_p[:, :nc, 0], axis=0)
    dice = (2.0 * inter + smooth) / (union + smooth)
    # Clamp: fp round-off could push dice marginally above 1, making the
    # fractional power of a negative number NaN (deliberate guard; the
    # reference would NaN in that edge case).
    neg_log = jnp.maximum(-jnp.log(dice), 0.0)
    return jnp.mean(jnp.power(neg_log, gamma))


def _reference(logits, targets, *, smooth=SMOOTH, gamma=GAMMA):
    pred = jax.nn.sigmoid(logits.astype(jnp.float32))
    t = targets.astype(jnp.float32)
    inter = jnp.sum(pred * t, axis=(2, 3))
    union = jnp.sum(pred, axis=(2, 3)) + jnp.sum(t, axis=(2, 3))
    dice = (2.0 * inter + smooth) / (union + smooth)
    return jnp.mean(jnp.power(-jnp.log(dice), gamma))


if __name__ == "__main__":
    key = jax.random.PRNGKey(0)
    k1, k2 = jax.random.split(key)

    N, C, H, W = 2, 4, 16, 16
    logits = jax.random.normal(k1, (N, C, H, W), dtype=jnp.float32)
    targets = (jax.random.uniform(k2, (N, C, H, W)) > 0.5).astype(jnp.float32)

    loss = exp_log_dice_loss(logits, targets)
    loss = jax.block_until_ready(loss)

    ref = jax.block_until_ready(_reference(logits, targets))
    assert jnp.allclose(loss, ref, rtol=1e-5, atol=1e-6), (loss, ref)

    print("KERNEL_OK")
</pallas_src>

<mosaic_0001>
module attributes {stable_mosaic.version = 11 : i64} {
  func.func @_partial_dice_kernel(%arg0: i32, %arg1: i32, %arg2: i32, %arg3: memref<8x256xf32, #tpu.memory_space<vmem>>, %arg4: memref<8x256xf32, #tpu.memory_space<vmem>>, %arg5: memref<1x8x1xf32, #tpu.memory_space<vmem>>, %arg6: memref<1x8x1xf32, #tpu.memory_space<vmem>>, %arg7: memref<8x1xf32, #tpu.memory_space<vmem>>, %arg8: memref<8x1xf32, #tpu.memory_space<vmem>>) attributes {dimension_semantics = [#tpu.dimension_semantics<parallel>, #tpu.dimension_semantics<parallel>, #tpu.dimension_semantics<arbitrary>], iteration_bounds = array<i64: 1, 1, 1>, scalar_prefetch = 0 : i64, scratch_operands = 2 : i64, tpu.core_type = #tpu.core_type<tc>, window_params = [{transform_indices = @transform_0, window_bounds = array<i64: 8, 256>}, {transform_indices = @transform_1, window_bounds = array<i64: 8, 256>}, {transform_indices = @transform_2, window_bounds = array<i64: 1, 8, 1>}, {transform_indices = @transform_3, window_bounds = array<i64: 1, 8, 1>}]} {
    %c0_i32 = arith.constant 0 : i32
    %0 = arith.cmpi eq, %arg2, %c0_i32 : i32
    %1 = arith.extui %0 : i1 to i32
    %c0_i32_0 = arith.constant 0 : i32
    %2 = arith.cmpi ne, %1, %c0_i32_0 : i32
    scf.if %2 {
      %cst_16 = arith.constant 0.000000e+00 : f32
      %25 = vector.broadcast %cst_16 : f32 to vector<8x1xf32>
      %c0_17 = arith.constant 0 : index
      %c0_18 = arith.constant 0 : index
      %26 = vector.load %arg7[%c0_17, %c0_18] : memref<8x1xf32, #tpu.memory_space<vmem>>, vector<8x1xf32>
      tpu.vector_store %arg7[%c0_17, %c0_18], %25 {strides = array<i32>} : memref<8x1xf32, #tpu.memory_space<vmem>>, vector<8x1xf32>,
      %cst_19 = arith.constant 0.000000e+00 : f32
      %27 = vector.broadcast %cst_19 : f32 to vector<8x1xf32>
      %c0_20 = arith.constant 0 : index
      %c0_21 = arith.constant 0 : index
      %28 = vector.load %arg8[%c0_20, %c0_21] : memref<8x1xf32, #tpu.memory_space<vmem>>, vector<8x1xf32>
      tpu.vector_store %arg8[%c0_20, %c0_21], %27 {strides = array<i32>} : memref<8x1xf32, #tpu.memory_space<vmem>>, vector<8x1xf32>,
    } else {
    }
    %c0 = arith.constant 0 : index
    %c0_1 = arith.constant 0 : index
    %3 = vector.load %arg3[%c0, %c0_1] : memref<8x256xf32, #tpu.memory_space<vmem>>, vector<8x256xf32>
    %c0_2 = arith.constant 0 : index
    %c0_3 = arith.constant 0 : index
    %4 = vector.load %arg4[%c0_2, %c0_3] : memref<8x256xf32, #tpu.memory_space<vmem>>, vector<8x256xf32>
    %5 = arith.negf %3 : vector<8x256xf32>
    %6 = math.exp %5 : vector<8x256xf32>
    %cst = arith.constant 1.000000e+00 : f32
    %7 = vector.broadcast %cst : f32 to vector<8x256xf32>
    %8 = arith.addf %7, %6 : vector<8x256xf32>
    %9 = arith.divf %7, %8 : vector<8x256xf32>
    %c0_4 = arith.constant 0 : index
    %c0_5 = arith.constant 0 : index
    %10 = vector.load %arg7[%c0_4, %c0_5] : memref<8x1xf32, #tpu.memory_space<vmem>>, vector<8x1xf32>
    %11 = arith.mulf %9, %4 : vector<8x256xf32>
    %cst_6 = arith.constant dense<0.000000e+00> : vector<8xf32>
    %12 = vector.multi_reduction <add>, %11, %cst_6 [1] : vector<8x256xf32> to vector<8xf32>
    %13 = vector.shape_cast %12 : vector<8xf32> to vector<8x1xf32>
    %14 = arith.addf %10, %13 : vector<8x1xf32>
    %c0_7 = arith.constant 0 : index
    %c0_8 = arith.constant 0 : index
    %15 = vector.load %arg7[%c0_7, %c0_8] : memref<8x1xf32, #tpu.memory_space<vmem>>, vector<8x1xf32>
    tpu.vector_store %arg7[%c0_7, %c0_8], %14 {strides = array<i32>} : memref<8x1xf32, #tpu.memory_space<vmem>>, vector<8x1xf32>,
    %c0_9 = arith.constant 0 : index
    %c0_10 = arith.constant 0 : index
    %16 = vector.load %arg8[%c0_9, %c0_10] : memref<8x1xf32, #tpu.memory_space<vmem>>, vector<8x1xf32>
    %17 = arith.addf %9, %4 : vector<8x256xf32>
    %cst_11 = arith.constant dense<0.000000e+00> : vector<8xf32>
    %18 = vector.multi_reduction <add>, %17, %cst_11 [1] : vector<8x256xf32> to vector<8xf32>
    %19 = vector.shape_cast %18 : vector<8xf32> to vector<8x1xf32>
    %20 = arith.addf %16, %19 : vector<8x1xf32>
    %c0_12 = arith.constant 0 : index
    %c0_13 = arith.constant 0 : index
    %21 = vector.load %arg8[%c0_12, %c0_13] : memref<8x1xf32, #tpu.memory_space<vmem>>, vector<8x1xf32>
    tpu.vector_store %arg8[%c0_12, %c0_13], %20 {strides = array<i32>} : memref<8x1xf32, #tpu.memory_space<vmem>>, vector<8x1xf32>,
    %c0_i32_14 = arith.constant 0 : i32
    %22 = arith.cmpi eq, %arg2, %c0_i32_14 : i32
    %23 = arith.extui %22 : i1 to i32
    %c0_i32_15 = arith.constant 0 : i32
    %24 = arith.cmpi ne, %23, %c0_i32_15 : i32
    scf.if %24 {
      %c0_16 = arith.constant 0 : index
      %c0_17 = arith.constant 0 : index
      %25 = vector.load %arg7[%c0_16, %c0_17] : memref<8x1xf32, #tpu.memory_space<vmem>>, vector<8x1xf32>
      %c0_18 = arith.constant 0 : index
      %c0_19 = arith.constant 0 : index
      %c0_20 = arith.constant 0 : index
      %26 = vector.load %arg5[%c0_18, %c0_19, %c0_20] : memref<1x8x1xf32, #tpu.memory_space<vmem>>, vector<1x8x1xf32>
      %27 = vector.shape_cast %26 : vector<1x8x1xf32> to vector<8x1xf32>
      %28 = vector.shape_cast %25 : vector<8x1xf32> to vector<1x8x1xf32>
      tpu.vector_store %arg5[%c0_18, %c0_19, %c0_20], %28 {strides = array<i32>} : memref<1x8x1xf32, #tpu.memory_space<vmem>>, vector<1x8x1xf32>,
      %c0_21 = arith.constant 0 : index
      %c0_22 = arith.constant 0 : index
      %29 = vector.load %arg8[%c0_21, %c0_22] : memref<8x1xf32, #tpu.memory_space<vmem>>, vector<8x1xf32>
      %c0_23 = arith.constant 0 : index
      %c0_24 = arith.constant 0 : index
      %c0_25 = arith.constant 0 : index
      %30 = vector.load %arg6[%c0_23, %c0_24, %c0_25] : memref<1x8x1xf32, #tpu.memory_space<vmem>>, vector<1x8x1xf32>
      %31 = vector.shape_cast %30 : vector<1x8x1xf32> to vector<8x1xf32>
      %32 = vector.shape_cast %29 : vector<8x1xf32> to vector<1x8x1xf32>
      tpu.vector_store %arg6[%c0_23, %c0_24, %c0_25], %32 {strides = array<i32>} : memref<1x8x1xf32, #tpu.memory_space<vmem>>, vector<1x8x1xf32>,
    } else {
    }
    return
  }
  func.func @transform_0(%arg0: i32, %arg1: i32, %arg2: i32) -> (i32, i32) {
    %c1_i32 = arith.constant 1 : i32
    %0 = arith.muli %arg1, %c1_i32 : i32
    %1 = arith.addi %0, %arg2 : i32
    %c0_i32 = arith.constant 0 : i32
    return %arg0, %1 : i32, i32
  }
  func.func @transform_1(%arg0: i32, %arg1: i32, %arg2: i32) -> (i32, i32) {
    %c1_i32 = arith.constant 1 : i32
    %0 = arith.muli %arg1, %c1_i32 : i32
    %1 = arith.addi %0, %arg2 : i32
    %c0_i32 = arith.constant 0 : i32
    return %arg0, %1 : i32, i32
  }
  func.func @transform_2(%arg0: i32, %arg1: i32, %arg2: i32) -> (i32, i32, i32) {
    %c0_i32 = arith.constant 0 : i32
    %c0_i32_0 = arith.constant 0 : i32
    return %arg1, %arg0, %c0_i32 : i32, i32, i32
  }
  func.func @transform_3(%arg0: i32, %arg1: i32, %arg2: i32) -> (i32, i32, i32) {
    %c0_i32 = arith.constant 0 : i32
    %c0_i32_0 = arith.constant 0 : i32
    return %arg1, %arg0, %c0_i32 : i32, i32, i32
  }
}

</mosaic_0001>

<bundles_post_ra>
// kernel: tpu_custom_call.1
= control target key start
LH: loop header
LB: loop body
LE: loop exit
PB: predicated region body
PF: predicated region fallthrough
CT: control target
= control target key end

     0   :  { %9 = vsyncpa [#allocation5], 0  ;;  %s204_s0 = inlined_call_operand.hbm [shape: f32[8,256], index: 0, kind: input, shape index: {}]   ;;  %s205_s1 = inlined_call_operand.hbm [shape: f32[8,256], index: 1, kind: input, shape index: {}]   ;;  %s206_s2 = inlined_call_operand.vmem [shape: f32[1,8,1], index: 2, kind: output, shape index: {0}]   ;;  %s207_s3 = inlined_call_operand.vmem [shape: f32[1,8,1], index: 3, kind: output, shape index: {1}]  }
   0x1   :  { %10 = vsyncpa [#allocation7], 0  ;;  %s163_s12 = smov [#allocation4]   ;;  %s164_s14 = smov [#allocation6]  }
   0x2   :  { %s21_s13 = sshll.u32 %s163_s12, 4  ;;  %s35_s15 = sshll.u32 %s164_s14, 4  ;;  %s22_s13 = int_to_ptr.vmem [resolvable:$true] %s21_s13  ;;  %s36_s15 = int_to_ptr.vmem [resolvable:$true] %s35_s15 }
   0x3   :  { %s127_s16 = scalar_lea.vmem %s22_s13, 256  ;;  %p132_p1 = scmp.lt.s32.totalorder %s22_s13, %s22_s13 }
   0x4   :  { %p128_p0 = scmp.ne.s32.totalorder %s22_s13, %s127_s16  ;;  %p133_p2 = scmp.lt.s32.totalorder %s127_s16, %s127_s16 }
   0x6   :  { %p134_p3 = por %p133_p2, %p132_p1 }
   0x8   :  { %p135_p4 = pnand %p134_p3, %p128_p0 }
   0xa   :  { %138 = shalt.err (!%p135_p4)
}
   0xb   :  { %24 = dma.hbm_to_vmem [thread:$0]  %s204_s0, 256, %s22_s13, [#allocation5]  }
   0xc   :  { %s147_s19 = scalar_lea.vmem %s36_s15, 256  ;;  %p152_p6 = scmp.lt.s32.totalorder %s36_s15, %s36_s15 }
   0xd   :  { %p148_p5 = scmp.ne.s32.totalorder %s36_s15, %s147_s19  ;;  %p153_p7 = scmp.lt.s32.totalorder %s147_s19, %s147_s19 }
   0xf   :  { %p154_p8 = por %p153_p7, %p152_p6 }
  0x11   :  { %p155_p9 = pnand %p154_p8, %p148_p5 }
  0x13   :  { %158 = shalt.err (!%p155_p9)
}
  0x14   :  { %38 = dma.hbm_to_vmem [thread:$0]  %s205_s1, 256, %s36_s15, [#allocation7]  }
  0x15   :  { %159 = dma.done.wait [#allocation5], 256  }
  0x16   :  { %160 = vsyncadd [#allocation5], 4294967040 }
  0x17   :  { %161 = dma.done.wait [#allocation7], 256  }
  0x18   :  { %162 = vsyncadd [#allocation7], 4294967040  ;;  %vm53_vm0 = vcmask 7168   ;;  %v165_v0 = vmov 0.0   ;;  %v56_v1 = vld [vmem:[#allocation4] sm:$0xff]  ;;  %v57_v2 = vld [vmem:[#allocation4 + $0x8] sm:$0xff] }
  0x19   :  { %54 = vst.msk [vmem:[#allocation2] sm:$0xff] %vm53_vm0, %v165_v0  ;;  %55 = vst.msk [vmem:[#allocation3] sm:$0xff] %vm53_vm0, %v165_v0  ;;  %v106_v3 = vmul.f32 -1.442695, %v56_v1  ;;  %v107_v4 = vmul.f32 -1.442695, %v57_v2 }
  0x1a   :  { %v58_v9 = vld [vmem:[#allocation6] sm:$0xff]  ;;  %v59_v10 = vld [vmem:[#allocation6 + $0x8] sm:$0xff] }
  0x1b   :  { %111 = vpow2.f32 %v106_v3 }
  0x1c   :  { %113 = vpow2.f32 %v107_v4 }
  0x20   :  { %v72_v19 = vld [vmem:[#allocation2] sm:$0xff]  ;;  %v81_v22 = vld [vmem:[#allocation3] sm:$0xff] }
  0x28   :  { %v112_v5 = vpop.eup %111 }
  0x29   :  { %v114_v6 = vpop.eup %113  ;;  %v66_v7 = vadd.f32 1.0, %v112_v5 }
  0x2a   :  { %v67_v8 = vadd.f32 1.0, %v114_v6 }
  0x2b   :  { %115 = vrcp.f32 %v66_v7 }
  0x2c   :  { %117 = vrcp.f32 %v67_v8 }
  0x38   :  { %v116_v11 = vpop.eup %115 }
  0x39   :  { %v118_v12 = vpop.eup %117  ;;  %v73_v13 = vmul.f32 %v116_v11, %v58_v9  ;;  %v82_v15 = vadd.f32 %v116_v11, %v58_v9 }
  0x3a   :  { %v74_v14 = vmul.f32 %v118_v12, %v59_v10  ;;  %v83_v16 = vadd.f32 %v118_v12, %v59_v10 }
  0x3c   :  { %v75_v17 = vadd.f32 %v74_v14, %v73_v13  ;;  %v84_v18 = vadd.f32 %v83_v16, %v82_v15 }
  0x3e   :  { %76 = vadd.xlane.f32.xlu0 %v75_v17 }
  0x42   :  { %85 = vadd.xlane.f32.xlu0 %v84_v18 }
  0xc7   :  { %v77_v20 = vpop.xlane.xlu0 %76 }
  0xc8   :  { %v78_v21 = vadd.f32 %v77_v20, %v72_v19 }
  0xca   :  { %80 = vst.msk [vmem:[#allocation2] sm:$0xff] %vm53_vm0, %v78_v21 }
  0xcb   :  { %v86_v23 = vpop.xlane.xlu0 %85 }
  0xcc   :  { %v87_v24 = vadd.f32 %v86_v23, %v81_v22 }
  0xce   :  { %88 = vst.msk [vmem:[#allocation3] sm:$0xff] %vm53_vm0, %v87_v24 }
  0xd1   :  { %v92_v25 = vld [vmem:[#allocation2] sm:$0xff] }
  0xd2   :  { %93 = vst.msk [vmem:[%s206_s2] sm:$0xff] %vm53_vm0, %v92_v25 }
  0xd5   :  { %v94_v26 = vld [vmem:[#allocation3] sm:$0xff] }
  0xd6   :  { %95 = vst.msk [vmem:[%s207_s3] sm:$0xff] %vm53_vm0, %v94_v26 }
  0xd7   :  { %104 = vsyncpa [#allocation5], 1 }
  0xd8   :  { %105 = vsyncpa [#allocation7], 1 }

</bundles_post_ra>
